<compile_context>
chip_gen: v7x
topology: tpu7x:2x2x1
jax: 0.10.0
libtpu: 0.0.40
codegen_flags: <defaults>
</compile_context>

<pallas_src>
import functools

import jax
import jax.numpy as jnp
from jax.experimental import pallas as pl
from jax.experimental.pallas import tpu as pltpu


# ---------------------------------------------------------------------------
# Pallas kernel: both heads fused, whole batch-tile per grid step.
# ---------------------------------------------------------------------------
def _fused_ensemble_kernel(patches_ref, wc_ref, bc_ref, w1_ref, b1_ref,
                           w2_ref, b2_ref, out_ref, *, tb, hw):
    # Conv as one matmul over all tb*hw im2col rows (single MXU push chain,
    # bf16 operands, f32 accumulation).
    feat = jnp.dot(patches_ref[...], wc_ref[...],
                   preferred_element_type=jnp.float32)            # (tb*hw, F) f32
    feat = jnp.maximum(feat + bc_ref[...], 0.0)                   # bias + ReLU on f32 (VPU)

    # Global average pool: the 1/HW scale was folded into w1 at fusion time,
    # so this is a plain per-batch sublane-axis sum (XLU).
    f = feat.shape[-1]
    pooled = feat.reshape(tb, hw, f).sum(axis=1)                  # (tb, F) f32

    # Batched two-layer MLP for both heads at once (block-diagonal w1 / w2).
    h = jnp.dot(pooled.astype(jnp.bfloat16), w1_ref[...],
                preferred_element_type=jnp.float32) + b1_ref[...]
    h = jnp.maximum(h, 0.0)                                       # (tb, Hd) f32
    out = jnp.dot(h.astype(jnp.bfloat16), w2_ref[...],
                  preferred_element_type=jnp.float32) + b2_ref[...]
    out_ref[...] = out                                            # lane-dense (tb, 128) store


# ---------------------------------------------------------------------------
# Glue (plain JAX): im2col, one-time head fusion, pallas_call wrapper.
# ---------------------------------------------------------------------------
def _im2col_3x3(x_nchw, dtype=jnp.bfloat16):
    """NCHW -> (B, H*W, C*9) patches for a 3x3 / pad=1 / stride=1 conv.

    Column order is (c, kh, kw), matching a PyTorch conv weight
    (C_out, C_in, 3, 3) flattened as weight.reshape(C_out, C_in*9).T.
    Built directly in `dtype` (bf16 for the kernel path) to avoid a large f32
    intermediate in HBM.
    """
    B, C, H, W = x_nchw.shape
    xp = jnp.pad(x_nchw.astype(dtype), ((0, 0), (0, 0), (1, 1), (1, 1)))
    cols = [xp[:, :, dh:dh + H, dw:dw + W] for dh in range(3) for dw in range(3)]
    patches = jnp.stack(cols, axis=2)                   # (B, C, 9, H, W)
    patches = patches.transpose(0, 3, 4, 1, 2)          # (B, H, W, C, 9)
    return patches.reshape(B, H * W, C * 9)


def init_head_params(key, c_in, c_conv, hidden, out_dim):
    """Deterministic synthetic parameters for one sub-model head."""
    k = jax.random.split(key, 3)
    wc = jax.random.normal(k[0], (c_in * 9, c_conv), jnp.float32) * (2.0 / (c_in * 9)) ** 0.5
    bc = jnp.zeros((1, c_conv), jnp.float32)
    w1 = jax.random.normal(k[1], (c_conv, hidden), jnp.float32) * (2.0 / c_conv) ** 0.5
    b1 = jnp.zeros((1, hidden), jnp.float32)
    w2 = jax.random.normal(k[2], (hidden, out_dim), jnp.float32) * (1.0 / hidden) ** 0.5
    b2 = jnp.zeros((1, out_dim), jnp.float32)
    return (wc, bc, w1, b1, w2, b2)


def fuse_ensemble_params(rot_params, trans_params, hw, out_pad=128):
    """Fuse rotation + translation heads into one block-structured weight set.

    Done ONCE at init time (hoisted out of the per-call forward).  The 1/HW
    global-average-pool scale is folded into w1 so the kernel pools with a sum.
    """
    wc_r, bc_r, w1_r, b1_r, w2_r, b2_r = rot_params
    wc_t, bc_t, w1_t, b1_t, w2_t, b2_t = trans_params
    K = wc_r.shape[0]
    Kp = ((K + 7) // 8) * 8                             # pad contraction dim to mult. of 8 only
    Fr, Ft = wc_r.shape[1], wc_t.shape[1]
    Hr, Ht = w1_r.shape[1], w1_t.shape[1]
    Dr, Dt = w2_r.shape[1], w2_t.shape[1]
    assert Dr + Dt <= out_pad

    wc = jnp.zeros((Kp, Fr + Ft), jnp.float32)
    wc = wc.at[:K, :Fr].set(wc_r).at[:K, Fr:].set(wc_t)
    bc = jnp.concatenate([bc_r, bc_t], axis=1)

    scale = 1.0 / float(hw)                             # fold avg-pool scale into w1
    w1 = jnp.zeros((Fr + Ft, Hr + Ht), jnp.float32)     # block-diagonal
    w1 = w1.at[:Fr, :Hr].set(w1_r * scale).at[Fr:, Hr:].set(w1_t * scale)
    b1 = jnp.concatenate([b1_r, b1_t], axis=1)

    w2 = jnp.zeros((Hr + Ht, out_pad), jnp.float32)     # block layout, lane-padded to 128
    w2 = w2.at[:Hr, :Dr].set(w2_r).at[Hr:, Dr:Dr + Dt].set(w2_t)
    b2 = jnp.zeros((1, out_pad), jnp.float32)
    b2 = b2.at[:, :Dr].set(b2_r).at[:, Dr:Dr + Dt].set(b2_t)

    fused = (wc.astype(jnp.bfloat16), bc,
             w1.astype(jnp.bfloat16), b1,
             w2.astype(jnp.bfloat16), b2)
    return fused, (Dr, Dt)


def implicit_se3_ensemble_forward(x_nchw, fused_params, *, dr, dt):
    """forward(input) -> (out_rot, out_trans), mirroring the PyTorch ensemble."""
    wc, bc, w1, b1, w2, b2 = fused_params
    B, C, H, W = x_nchw.shape
    HW = H * W
    Kp, F = wc.shape
    Hd = w1.shape[1]
    OUT_PAD = w2.shape[1]

    # im2col directly in bf16 (9x blow-up never materialized in f32).
    patches = _im2col_3x3(x_nchw, dtype=jnp.bfloat16)             # (B, HW, C*9)
    K = patches.shape[-1]
    patches = jnp.pad(patches, ((0, 0), (0, 0), (0, Kp - K)))     # K -> multiple of 8
    patches = patches.reshape(B * HW, Kp)

    # Whole batch in one grid step: at these sizes the op is step-overhead /
    # DMA-latency bound, so collapsing the grid amortizes the ~600-cycle/step cost.
    TB = B
    kernel = functools.partial(_fused_ensemble_kernel, tb=TB, hw=HW)

    grid_spec = pltpu.PrefetchScalarGridSpec(
        num_scalar_prefetch=0,
        grid=(pl.cdiv(B, TB),),                                   # == 1 step here
        in_specs=[
            pl.BlockSpec((TB * HW, Kp), lambda i: (i, 0)),        # batch-tile of patches
            pl.BlockSpec((Kp, F), lambda i: (0, 0)),              # fused conv weight
            pl.BlockSpec((1, F), lambda i: (0, 0)),
            pl.BlockSpec((F, Hd), lambda i: (0, 0)),              # block-diag w1 (1/HW folded)
            pl.BlockSpec((1, Hd), lambda i: (0, 0)),
            pl.BlockSpec((Hd, OUT_PAD), lambda i: (0, 0)),        # block w2 (lane-padded)
            pl.BlockSpec((1, OUT_PAD), lambda i: (0, 0)),
        ],
        out_specs=pl.BlockSpec((TB, OUT_PAD), lambda i: (i, 0)),
    )

    out = pl.pallas_call(
        kernel,
        out_shape=jax.ShapeDtypeStruct((B, OUT_PAD), jnp.float32),
        grid_spec=grid_spec,
    )(patches, wc, bc, w1, b1, w2, b2)

    return out[:, :dr], out[:, dr:dr + dt]


# ---------------------------------------------------------------------------
# Pure-JAX f32 reference for correctness checking.
# ---------------------------------------------------------------------------
def _reference_forward(x_nchw, rot_params, trans_params):
    B, C, H, W = x_nchw.shape
    patches = _im2col_3x3(x_nchw, dtype=jnp.float32).reshape(B * H * W, C * 9)

    def head(params):
        wc, bc, w1, b1, w2, b2 = params
        feat = jnp.maximum(patches @ wc + bc, 0.0)
        pooled = feat.reshape(B, H * W, -1).mean(axis=1)
        h = jnp.maximum(pooled @ w1 + b1, 0.0)
        return h @ w2 + b2

    return head(rot_params), head(trans_params)


if __name__ == "__main__":
    key = jax.random.PRNGKey(0)
    kx, kr, kt = jax.random.split(key, 3)

    B, C, H, W = 2, 4, 16, 16          # small NCHW input
    C_CONV, HIDDEN = 32, 32
    ROT_OUT, TRANS_OUT = 9, 3          # flattened 3x3 rotation / 3-vector translation

    x = jax.random.normal(kx, (B, C, H, W), jnp.float32)
    rot_params = init_head_params(kr, C, C_CONV, HIDDEN, ROT_OUT)
    trans_params = init_head_params(kt, C, C_CONV, HIDDEN, TRANS_OUT)

    # One-time weight fusion / bf16 casts, hoisted out of the forward hot path.
    fused_params, (dr, dt) = fuse_ensemble_params(rot_params, trans_params, H * W)
    fused_params = jax.block_until_ready(fused_params)

    fwd = jax.jit(functools.partial(implicit_se3_ensemble_forward, dr=dr, dt=dt))
    out_rot, out_trans = fwd(x, fused_params)
    jax.block_until_ready((out_rot, out_trans))

    assert out_rot.shape == (B, ROT_OUT) and out_trans.shape == (B, TRANS_OUT)

    ref_rot, ref_trans = _reference_forward(x, rot_params, trans_params)
    assert jnp.allclose(out_rot, ref_rot, atol=1e-1, rtol=1e-1), "rotation head mismatch"
    assert jnp.allclose(out_trans, ref_trans, atol=1e-1, rtol=1e-1), "translation head mismatch"

    print("KERNEL_OK")
</pallas_src>

<mosaic_0001>
module attributes {stable_mosaic.version = 11 : i64} {
  func.func @_fused_ensemble_kernel(%arg0: i32, %arg1: memref<512x40xbf16, #tpu.memory_space<vmem>>, %arg2: memref<40x64xbf16, #tpu.memory_space<vmem>>, %arg3: memref<1x64xf32, #tpu.memory_space<vmem>>, %arg4: memref<64x64xbf16, #tpu.memory_space<vmem>>, %arg5: memref<1x64xf32, #tpu.memory_space<vmem>>, %arg6: memref<64x128xbf16, #tpu.memory_space<vmem>>, %arg7: memref<1x128xf32, #tpu.memory_space<vmem>>, %arg8: memref<2x128xf32, #tpu.memory_space<vmem>>) attributes {dimension_semantics = [#tpu.dimension_semantics<arbitrary>], iteration_bounds = array<i64: 1>, scalar_prefetch = 0 : i64, scratch_operands = 0 : i64, tpu.core_type = #tpu.core_type<tc>, window_params = [{transform_indices = @transform_0, window_bounds = array<i64: 512, 40>}, {pipeline_mode = #tpu.pipeline_mode<synchronous>, transform_indices = @transform_1, window_bounds = array<i64: 40, 64>}, {pipeline_mode = #tpu.pipeline_mode<synchronous>, transform_indices = @transform_2, window_bounds = array<i64: 1, 64>}, {pipeline_mode = #tpu.pipeline_mode<synchronous>, transform_indices = @transform_3, window_bounds = array<i64: 64, 64>}, {pipeline_mode = #tpu.pipeline_mode<synchronous>, transform_indices = @transform_4, window_bounds = array<i64: 1, 64>}, {pipeline_mode = #tpu.pipeline_mode<synchronous>, transform_indices = @transform_5, window_bounds = array<i64: 64, 128>}, {pipeline_mode = #tpu.pipeline_mode<synchronous>, transform_indices = @transform_6, window_bounds = array<i64: 1, 128>}, {transform_indices = @transform_7, window_bounds = array<i64: 2, 128>}]} {
    %c0 = arith.constant 0 : index
    %c0_0 = arith.constant 0 : index
    %0 = vector.load %arg1[%c0, %c0_0] : memref<512x40xbf16, #tpu.memory_space<vmem>>, vector<512x40xbf16>
    %c0_1 = arith.constant 0 : index
    %c0_2 = arith.constant 0 : index
    %1 = vector.load %arg2[%c0_1, %c0_2] : memref<40x64xbf16, #tpu.memory_space<vmem>>, vector<40x64xbf16>
    %cst = arith.constant dense<0.000000e+00> : vector<512x64xf32>
    %2 = tpu.matmul %0, %1, %cst {dimension_numbers = #tpu.dot_dimension_numbers<[1], [0], [0], [1], [0, 0, 1, 1], [], []>} : vector<512x40xbf16>, vector<40x64xbf16>, vector<512x64xf32> -> vector<512x64xf32>
    %c0_3 = arith.constant 0 : index
    %c0_4 = arith.constant 0 : index
    %3 = vector.load %arg3[%c0_3, %c0_4] : memref<1x64xf32, #tpu.memory_space<vmem>>, vector<1x64xf32>
    %4 = vector.broadcast %3 : vector<1x64xf32> to vector<512x64xf32>
    %5 = arith.addf %2, %4 : vector<512x64xf32>
    %cst_5 = arith.constant 0.000000e+00 : f32
    %6 = vector.broadcast %cst_5 : f32 to vector<512x64xf32>
    %7 = arith.maximumf %5, %6 : vector<512x64xf32>
    %8 = vector.shape_cast %7 : vector<512x64xf32> to vector<2x256x64xf32>
    %cst_6 = arith.constant dense<0.000000e+00> : vector<2x64xf32>
    %9 = vector.multi_reduction <add>, %8, %cst_6 [1] : vector<2x256x64xf32> to vector<2x64xf32>
    %10 = arith.truncf %9 : vector<2x64xf32> to vector<2x64xbf16>
    %c0_7 = arith.constant 0 : index
    %c0_8 = arith.constant 0 : index
    %11 = vector.load %arg4[%c0_7, %c0_8] : memref<64x64xbf16, #tpu.memory_space<vmem>>, vector<64x64xbf16>
    %cst_9 = arith.constant dense<0.000000e+00> : vector<2x64xf32>
    %12 = tpu.matmul %10, %11, %cst_9 {dimension_numbers = #tpu.dot_dimension_numbers<[1], [0], [0], [1], [0, 0, 1, 1], [], []>} : vector<2x64xbf16>, vector<64x64xbf16>, vector<2x64xf32> -> vector<2x64xf32>
    %c0_10 = arith.constant 0 : index
    %c0_11 = arith.constant 0 : index
    %13 = vector.load %arg5[%c0_10, %c0_11] : memref<1x64xf32, #tpu.memory_space<vmem>>, vector<1x64xf32>
    %14 = vector.broadcast %13 : vector<1x64xf32> to vector<2x64xf32>
    %15 = arith.addf %12, %14 : vector<2x64xf32>
    %cst_12 = arith.constant 0.000000e+00 : f32
    %16 = vector.broadcast %cst_12 : f32 to vector<2x64xf32>
    %17 = arith.maximumf %15, %16 : vector<2x64xf32>
    %18 = arith.truncf %17 : vector<2x64xf32> to vector<2x64xbf16>
    %c0_13 = arith.constant 0 : index
    %c0_14 = arith.constant 0 : index
    %19 = vector.load %arg6[%c0_13, %c0_14] : memref<64x128xbf16, #tpu.memory_space<vmem>>, vector<64x128xbf16>
    %cst_15 = arith.constant dense<0.000000e+00> : vector<2x128xf32>
    %20 = tpu.matmul %18, %19, %cst_15 {dimension_numbers = #tpu.dot_dimension_numbers<[1], [0], [0], [1], [0, 0, 1, 1], [], []>} : vector<2x64xbf16>, vector<64x128xbf16>, vector<2x128xf32> -> vector<2x128xf32>
    %c0_16 = arith.constant 0 : index
    %c0_17 = arith.constant 0 : index
    %21 = vector.load %arg7[%c0_16, %c0_17] : memref<1x128xf32, #tpu.memory_space<vmem>>, vector<1x128xf32>
    %22 = vector.broadcast %21 : vector<1x128xf32> to vector<2x128xf32>
    %23 = arith.addf %20, %22 : vector<2x128xf32>
    %c0_18 = arith.constant 0 : index
    %c0_19 = arith.constant 0 : index
    %24 = vector.load %arg8[%c0_18, %c0_19] : memref<2x128xf32, #tpu.memory_space<vmem>>, vector<2x128xf32>
    tpu.vector_store %arg8[%c0_18, %c0_19], %23 {strides = array<i32>} : memref<2x128xf32, #tpu.memory_space<vmem>>, vector<2x128xf32>,
    return
  }
  func.func @transform_0(%arg0: i32) -> (i32, i32) {
    %c0_i32 = arith.constant 0 : i32
    %c0_i32_0 = arith.constant 0 : i32
    return %arg0, %c0_i32 : i32, i32
  }
  func.func @transform_1(%arg0: i32) -> (i32, i32) {
    %c0_i32 = arith.constant 0 : i32
    %c0_i32_0 = arith.constant 0 : i32
    %c0_i32_1 = arith.constant 0 : i32
    return %c0_i32, %c0_i32_0 : i32, i32
  }
  func.func @transform_2(%arg0: i32) -> (i32, i32) {
    %c0_i32 = arith.constant 0 : i32
    %c0_i32_0 = arith.constant 0 : i32
    %c0_i32_1 = arith.constant 0 : i32
    return %c0_i32, %c0_i32_0 : i32, i32
  }
  func.func @transform_3(%arg0: i32) -> (i32, i32) {
    %c0_i32 = arith.constant 0 : i32
    %c0_i32_0 = arith.constant 0 : i32
    %c0_i32_1 = arith.constant 0 : i32
    return %c0_i32, %c0_i32_0 : i32, i32
  }
  func.func @transform_4(%arg0: i32) -> (i32, i32) {
    %c0_i32 = arith.constant 0 : i32
    %c0_i32_0 = arith.constant 0 : i32
    %c0_i32_1 = arith.constant 0 : i32
    return %c0_i32, %c0_i32_0 : i32, i32
  }
  func.func @transform_5(%arg0: i32) -> (i32, i32) {
    %c0_i32 = arith.constant 0 : i32
    %c0_i32_0 = arith.constant 0 : i32
    %c0_i32_1 = arith.constant 0 : i32
    return %c0_i32, %c0_i32_0 : i32, i32
  }
  func.func @transform_6(%arg0: i32) -> (i32, i32) {
    %c0_i32 = arith.constant 0 : i32
    %c0_i32_0 = arith.constant 0 : i32
    %c0_i32_1 = arith.constant 0 : i32
    return %c0_i32, %c0_i32_0 : i32, i32
  }
  func.func @transform_7(%arg0: i32) -> (i32, i32) {
    %c0_i32 = arith.constant 0 : i32
    %c0_i32_0 = arith.constant 0 : i32
    return %arg0, %c0_i32 : i32, i32
  }
}

</mosaic_0001>

<bundles_post_ra>
// kernel: implicit_se3_ensemble_forward.1
= control target key start
LH: loop header
LB: loop body
LE: loop exit
PB: predicated region body
PF: predicated region fallthrough
CT: control target
= control target key end

     0   :  { %vm278_vm0 = vcmask 326656   ;;  %vm375_vm1 = vcmask 1043456   ;;  %v1323_v36 = vmov 0.0   ;;  %vm732_vm2 = vcmask 523264   ;;  %s1758_s1 = inlined_call_operand.vmem [shape: bf16[40,64], index: 1, kind: input, shape index: {}]   ;;  %s1759_s0 = inlined_call_operand.vmem [shape: bf16[512,40], index: 0, kind: input, shape index: {}]   ;;  %s1760_s3 = inlined_call_operand.vmem [shape: bf16[64,64], index: 3, kind: input, shape index: {}]   ;;  %s1761_s2 = inlined_call_operand.vmem [shape: f32[1,64], index: 2, kind: input, shape index: {}]   ;;  %s1762_s5 = inlined_call_operand.vmem [shape: bf16[64,128], index: 5, kind: input, shape index: {}]   ;;  %s1763_s4 = inlined_call_operand.vmem [shape: f32[1,64], index: 4, kind: input, shape index: {}]   ;;  %s1764_s6 = inlined_call_operand.vmem [shape: f32[1,128], index: 6, kind: input, shape index: {}]   ;;  %s1765_s7 = inlined_call_operand.vmem [shape: f32[2,128], index: 7, kind: output, shape index: {}]  }
   0x1   :  { %v1280_v0 = vld [vmem:[%s1758_s1] sm:$0xff]   ;;  %v1281_v1 = vld [vmem:[%s1758_s1 + $0x8] sm:$0xff]   ;;  %v1282_v3 = vld [vmem:[%s1758_s1 + $0x10] ss:$0 sps:$4 sm:$0xff]   ;;  %vm1324_vm3 = vmmov 0   ;;  %vm892_vm4 = vcmask 1041409  }
   0x2   :  { %1176 = vmatprep.subr.bf16.mxu0 %v1280_v0  ;;  %1270 = vmatprep.subr.bf16.mxu1 %v1280_v0  ;;  %v1283_v2 = vld [vmem:[%s1759_s0] sm:$0xff]   ;;  %v377_v4 = vsel %vm375_vm1, %v1282_v3, 0  ;;  %v1284_v5 = vld [vmem:[%s1759_s0 + $0x8] sm:$0xff]   ;;  %v1285_v6 = vld [vmem:[%s1759_s0 + $0x10] sm:$0xff]  }
   0x3   :  { %1177 = vmatpush3.bf16.msra.mxu0 %v1280_v0  ;;  %1273 = vmatpush3.bf16.msra.mxu1 %v1280_v0  ;;  %v1286_v7 = vld [vmem:[%s1759_s0 + $0x18] sm:$0xff]   ;;  %v1287_v8 = vld [vmem:[%s1759_s0 + $0x20] sm:$0xff]   ;;  %v1304_v10 = vld [vmem:[%s1759_s0 + $0xa8] sm:$0xff]  }
   0x4   :  { %1178 = vmatprep.subr.bf16.mxu0 %v1281_v1  ;;  %1271 = vmatprep.subr.bf16.mxu1 %v1281_v1  ;;  %v1303_v9 = vld [vmem:[%s1759_s0 + $0xa0] sm:$0xff]   ;;  %v1305_v11 = vld [vmem:[%s1759_s0 + $0xb0] sm:$0xff]   ;;  %v1288_v12 = vld [vmem:[%s1759_s0 + $0x28] sm:$0xff]  }
   0x5   :  { %1182 = vmatprep.mubr.msk.bf16.mxu0 %vm278_vm0, %v1283_v2  ;;  %1222 = vmatprep.mubr.msk.bf16.mxu1 %vm278_vm0, %v1303_v9  ;;  %v1289_v13 = vld [vmem:[%s1759_s0 + $0x30] sm:$0xff]   ;;  %v1306_v14 = vld [vmem:[%s1759_s0 + $0xb8] sm:$0xff]   ;;  %v1307_v15 = vld [vmem:[%s1759_s0 + $0xc0] sm:$0xff]  }
   0x6   :  { %v1290_v16 = vld [vmem:[%s1759_s0 + $0x38] sm:$0xff]   ;;  %v1291_v17 = vld [vmem:[%s1759_s0 + $0x40] sm:$0xff]   ;;  %v1308_v18 = vld [vmem:[%s1759_s0 + $0xc8] sm:$0xff]  }
   0x7   :  { %1179 = vmatpush3.bf16.msra.mxu0 %v1281_v1  ;;  %1274 = vmatpush3.bf16.msra.mxu1 %v1281_v1  ;;  %v1309_v19 = vld [vmem:[%s1759_s0 + $0xd0] sm:$0xff]   ;;  %v1292_v20 = vld [vmem:[%s1759_s0 + $0x48] sm:$0xff]   ;;  %v1310_v22 = vld [vmem:[%s1759_s0 + $0xd8] sm:$0xff]  }
   0x8   :  { %1276 = vmatprep.subr.msk.bf16.mxu0 %vm375_vm1, %v1282_v3  ;;  %1277 = vmatprep.subr.msk.bf16.mxu1 %vm375_vm1, %v1282_v3  ;;  %v1293_v21 = vld [vmem:[%s1759_s0 + $0x50] sm:$0xff]   ;;  %v1311_v23 = vld [vmem:[%s1759_s0 + $0xe0] sm:$0xff]   ;;  %v1294_v24 = vld [vmem:[%s1759_s0 + $0x58] sm:$0xff]  }
   0x9   :  { %v1295_v25 = vld [vmem:[%s1759_s0 + $0x60] sm:$0xff]   ;;  %v1312_v26 = vld [vmem:[%s1759_s0 + $0xe8] sm:$0xff]   ;;  %v1313_v27 = vld [vmem:[%s1759_s0 + $0xf0] sm:$0xff]  }
   0xa   :  { %v1296_v28 = vld [vmem:[%s1759_s0 + $0x68] sm:$0xff]   ;;  %v1297_v29 = vld [vmem:[%s1759_s0 + $0x70] sm:$0xff]   ;;  %v1314_v30 = vld [vmem:[%s1759_s0 + $0xf8] sm:$0xff]  }
   0xb   :  { %1181 = vmatpush3.bf16.msra.mxu0 %v377_v4  ;;  %1275 = vmatpush3.bf16.msra.mxu1 %v377_v4  ;;  %v1298_v31 = vld [vmem:[%s1759_s0 + $0x78] sm:$0xff]   ;;  %v1299_v32 = vld [vmem:[%s1759_s0 + $0x80] sm:$0xff]   ;;  %v1300_v33 = vld [vmem:[%s1759_s0 + $0x88] sm:$0xff]  }
   0xc   :  { %v1301_v34 = vld [vmem:[%s1759_s0 + $0x90] sm:$0xff]   ;;  %v1302_v35 = vld [vmem:[%s1759_s0 + $0x98] sm:$0xff]   ;;  %1246 = vmatprep.subr.bf16.mxu1 %v1323_v36  ;;  %v1315_v37 = vld [vmem:[%s1760_s3] sm:$0xff]  }
   0xd   :  { %v1510_v38 = vld [vmem:[%s1761_s2] ss:$0 sm:$0xff]  ;;  %v1316_v39 = vld [vmem:[%s1760_s3 + $0x8] sm:$0xff]  }
   0xe   :  { %1183 = vmatmul.mubr.msk.bf16.vlgmr.msra.gmra.mrb[0].mxu0 %vm278_vm0, %v1284_v5  ;;  %1223 = vmatmul.mubr.msk.bf16.vlgmr.msra.gmra.mrb[0].mxu1 %vm278_vm0, %v1304_v10 }
   0xf   :  { %1186 = vmatprep.mubr.msk.bf16.mxu0 %vm278_vm0, %v1285_v6  ;;  %1226 = vmatprep.mubr.msk.bf16.mxu1 %vm278_vm0, %v1305_v11 }
  0x10   :  { %1247 = vmatpush3.bf16.msra.mxu1 %v1315_v37 }
  0x11   :  { %1248 = vmatprep.subr.bf16.mxu1 %v1323_v36 }
  0x14   :  { %1249 = vmatpush3.bf16.msra.mxu1 %v1316_v39 }
  0x15   :  { %1250 = vmatprep.subr.bf16.mxu1 %v1323_v36 }
  0x16   :  { %1187 = vmatmul.mubr.msk.bf16.gmra.mrb[4].mxu0 %vm278_vm0, %v1286_v7  ;;  %1227 = vmatmul.mubr.msk.bf16.gmra.mrb[4].mxu1 %vm278_vm0, %v1306_v14 }
  0x17   :  { %1190 = vmatprep.mubr.msk.bf16.mxu0 %vm278_vm0, %v1287_v8  ;;  %1230 = vmatprep.mubr.msk.bf16.mxu1 %vm278_vm0, %v1307_v15 }
  0x1e   :  { %1191 = vmatmul.mubr.msk.bf16.gmra.mrb[8].mxu0 %vm278_vm0, %v1288_v12  ;;  %1231 = vmatmul.mubr.msk.bf16.gmra.mrb[8].mxu1 %vm278_vm0, %v1308_v18 }
  0x1f   :  { %1194 = vmatprep.mubr.msk.bf16.mxu0 %vm278_vm0, %v1289_v13  ;;  %1234 = vmatprep.mubr.msk.bf16.mxu1 %vm278_vm0, %v1309_v19 }
  0x26   :  { %1195 = vmatmul.mubr.msk.bf16.gmra.mrb[12].mxu0 %vm278_vm0, %v1290_v16  ;;  %1235 = vmatmul.mubr.msk.bf16.gmra.mrb[12].mxu1 %vm278_vm0, %v1310_v22 }
  0x27   :  { %1198 = vmatprep.mubr.msk.bf16.mxu0 %vm278_vm0, %v1291_v17  ;;  %1238 = vmatprep.mubr.msk.bf16.mxu1 %vm278_vm0, %v1311_v23  ;;  %v1317_v17 = vld [vmem:[%s1760_s3 + $0x10] sm:$0xff]  }
  0x28   :  { %1251 = vmatpush3.bf16.msra.mxu1 %v1317_v17 }
  0x29   :  { %1252 = vmatprep.subr.bf16.mxu1 %v1323_v36 }
  0x2e   :  { %1199 = vmatmul.mubr.msk.bf16.gmra.mrb[16].mxu0 %vm278_vm0, %v1292_v20  ;;  %1239 = vmatmul.mubr.msk.bf16.gmra.mrb[16].mxu1 %vm278_vm0, %v1312_v26 }
  0x2f   :  { %1202 = vmatprep.mubr.msk.bf16.mxu0 %vm278_vm0, %v1293_v21  ;;  %1242 = vmatprep.mubr.msk.bf16.mxu1 %vm278_vm0, %v1313_v27 }
  0x36   :  { %1203 = vmatmul.mubr.msk.bf16.gmra.mrb[20].mxu0 %vm278_vm0, %v1294_v24  ;;  %1243 = vmatmul.mubr.msk.bf16.gmra.mrb[20].mxu1 %vm278_vm0, %v1314_v30 }
  0x37   :  { %1206 = vmatprep.mubr.msk.bf16.mxu0 %vm278_vm0, %v1295_v25  ;;  %1254 = vmatprep.mubr.msk.bf16.mxu1 %vm1324_vm3, %v1323_v36 }
  0x3e   :  { %1207 = vmatmul.mubr.msk.bf16.gmra.mrb[24].mxu0 %vm278_vm0, %v1296_v28 }
  0x3f   :  { %1210 = vmatprep.mubr.msk.bf16.mxu0 %vm278_vm0, %v1297_v29 }
  0x46   :  { %1211 = vmatmul.mubr.msk.bf16.gmra.mrb[28].mxu0 %vm278_vm0, %v1298_v31  ;;  %v1318_v31 = vld [vmem:[%s1760_s3 + $0x18] sm:$0xff]  }
  0x47   :  { %1214 = vmatprep.mubr.msk.bf16.mxu0 %vm278_vm0, %v1299_v32  ;;  %1253 = vmatpush3.bf16.msra.mxu1 %v1318_v31 }
  0x48   :  { %1258 = vmatprep.subr.bf16.mxu1 %v1323_v36 }
  0x4e   :  { %1215 = vmatmul.mubr.msk.bf16.gmra.mrb[32].mxu0 %vm278_vm0, %v1300_v33 }
  0x4f   :  { %1218 = vmatprep.mubr.msk.bf16.mxu0 %vm278_vm0, %v1301_v34 }
  0x56   :  { %1219 = vmatmul.mubr.msk.bf16.gmra.mrb[36].mxu0 %vm278_vm0, %v1302_v35 }
  0xe1   :  { %v1184_v40 = vpop.f32.mrb[0].mxu0  ;;  %v1528_v3 = vpop.f32.mrb[0].mxu1 }
  0xe2   :  { %v413_v41 = vpop.f32.mrb[1].mxu0  ;;  %v422_v42 = vadd.f32 %v1184_v40, %v1510_v38  ;;  %v1530_v5 = vpop.f32.mrb[1].mxu1 }
  0xe3   :  { %v414_v43 = vadd.f32 %v1510_v38, %v413_v41  ;;  %v1185_v44 = vpop.f32.mrb[2].mxu0  ;;  %v1533_v9 = vpop.f32.mrb[2].mxu1 }
  0xe4   :  { %v416_v45 = vpop.f32.mrb[3].mxu0  ;;  %v425_v47 = vadd.f32 %v1185_v44, %v1510_v38  ;;  %v670_v49 = vmax.f32 %v422_v42, 0.0  ;;  %v1535_v11 = vpop.f32.mrb[3].mxu1 }
  0xe5   :  { %v668_v46 = vmax.f32 %v414_v43, 0.0  ;;  %v417_v48 = vadd.f32 %v1510_v38, %v416_v45 }
  0xe6   :  { %v671_v52 = vmax.f32 %v425_v47, 0.0  ;;  %v736_v57 = vsel %vm732_vm2, %v670_v49, 0.0 }
  0xe7   :  { %v669_v50 = vmax.f32 %v417_v48, 0.0  ;;  %v733_v51 = vsel %vm732_vm2, %v668_v46, 0.0 }
  0xe8   :  { %v738_v63 = vsel %vm732_vm2, %v671_v52, 0.0 }
  0xe9   :  { %v734_v53 = vsel %vm732_vm2, %v669_v50, 0.0  ;;  %v1188_v54 = vpop.f32.mrb[4].mxu0  ;;  %v1547_v28 = vpop.f32.mrb[4].mxu1 }
  0xea   :  { %v735_v55 = vadd.f32 %v734_v53, %v733_v51  ;;  %v429_v56 = vpop.f32.mrb[5].mxu0  ;;  %v438_v58 = vadd.f32 %v1188_v54, %v1510_v38  ;;  %v1550_v30 = vpop.f32.mrb[5].mxu1 }
  0xeb   :  { %v430_v59 = vadd.f32 %v1510_v38, %v429_v56  ;;  %v1189_v60 = vpop.f32.mrb[6].mxu0  ;;  %v1556_v35 = vpop.f32.mrb[6].mxu1 }
  0xec   :  { %v737_v61 = vadd.f32 %v736_v57, %v735_v55  ;;  %v432_v62 = vpop.f32.mrb[7].mxu0  ;;  %v441_v1 = vadd.f32 %v1189_v60, %v1510_v38  ;;  %v674_v6 = vmax.f32 %v438_v58, 0.0  ;;  %v1558_v39 = vpop.f32.mrb[7].mxu1 }
  0xed   :  { %v672_v0 = vmax.f32 %v430_v59, 0.0  ;;  %v433_v2 = vadd.f32 %v1510_v38, %v432_v62 }
  0xee   :  { %v739_v4 = vadd.f32 %v738_v63, %v737_v61  ;;  %v675_v12 = vmax.f32 %v441_v1, 0.0  ;;  %v744_v18 = vsel %vm732_vm2, %v674_v6, 0.0 }
  0xef   :  { %v740_v7 = vsel %vm732_vm2, %v672_v0, 0.0  ;;  %v673_v8 = vmax.f32 %v433_v2, 0.0 }
  0xf0   :  { %v741_v10 = vadd.f32 %v740_v7, %v739_v4  ;;  %v746_v24 = vsel %vm732_vm2, %v675_v12, 0.0 }
  0xf1   :  { %v742_v13 = vsel %vm732_vm2, %v673_v8, 0.0  ;;  %v1192_v14 = vpop.f32.mrb[8].mxu0  ;;  %v1570_v55 = vpop.f32.mrb[8].mxu1 }
  0xf2   :  { %v743_v15 = vadd.f32 %v742_v13, %v741_v10  ;;  %v445_v16 = vpop.f32.mrb[9].mxu0  ;;  %v454_v19 = vadd.f32 %v1192_v14, %v1510_v38  ;;  %v1572_v57 = vpop.f32.mrb[9].mxu1 }
  0xf3   :  { %v446_v20 = vadd.f32 %v1510_v38, %v445_v16  ;;  %v1193_v21 = vpop.f32.mrb[10].mxu0  ;;  %v1575_v61 = vpop.f32.mrb[10].mxu1 }
  0xf4   :  { %v745_v22 = vadd.f32 %v744_v18, %v743_v15  ;;  %v448_v23 = vpop.f32.mrb[11].mxu0  ;;  %v457_v26 = vadd.f32 %v1193_v21, %v1510_v38  ;;  %v678_v32 = vmax.f32 %v454_v19, 0.0  ;;  %v1577_v63 = vpop.f32.mrb[11].mxu1 }
  0xf5   :  { %v676_v25 = vmax.f32 %v446_v20, 0.0  ;;  %v449_v27 = vadd.f32 %v1510_v38, %v448_v23 }
  0xf6   :  { %v747_v29 = vadd.f32 %v746_v24, %v745_v22  ;;  %v679_v40 = vmax.f32 %v457_v26, 0.0  ;;  %v752_v45 = vsel %vm732_vm2, %v678_v32, 0.0 }
  0xf7   :  { %v748_v33 = vsel %vm732_vm2, %v676_v25, 0.0  ;;  %v677_v34 = vmax.f32 %v449_v27, 0.0 }
  0xf8   :  { %v749_v37 = vadd.f32 %v748_v33, %v747_v29  ;;  %v754_v51 = vsel %vm732_vm2, %v679_v40, 0.0 }
  0xf9   :  { %v750_v41 = vsel %vm732_vm2, %v677_v34, 0.0  ;;  %v1196_v42 = vpop.f32.mrb[12].mxu0  ;;  %v1586_v19 = vpop.f32.mrb[12].mxu1 }
  0xfa   :  { %v751_v43 = vadd.f32 %v750_v41, %v749_v37  ;;  %v461_v44 = vpop.f32.mrb[13].mxu0  ;;  %v470_v46 = vadd.f32 %v1196_v42, %v1510_v38  ;;  %v1588_v21 = vpop.f32.mrb[13].mxu1 }
  0xfb   :  { %v462_v47 = vadd.f32 %v1510_v38, %v461_v44  ;;  %v1197_v48 = vpop.f32.mrb[14].mxu0  ;;  %v1591_v25 = vpop.f32.mrb[14].mxu1 }
  0xfc   :  { %v753_v49 = vadd.f32 %v752_v45, %v751_v43  ;;  %v464_v50 = vpop.f32.mrb[15].mxu0  ;;  %v473_v53 = vadd.f32 %v1197_v48, %v1510_v38  ;;  %v682_v58 = vmax.f32 %v470_v46, 0.0  ;;  %v1593_v27 = vpop.f32.mrb[15].mxu1 }
  0xfd   :  { %v680_v52 = vmax.f32 %v462_v47, 0.0  ;;  %v465_v54 = vadd.f32 %v1510_v38, %v464_v50 }
  0xfe   :  { %v755_v56 = vadd.f32 %v754_v51, %v753_v49  ;;  %v683_v0 = vmax.f32 %v473_v53, 0.0  ;;  %v760_v7 = vsel %vm732_vm2, %v682_v58, 0.0 }
  0xff   :  { %v756_v59 = vsel %vm732_vm2, %v680_v52, 0.0  ;;  %v681_v60 = vmax.f32 %v465_v54, 0.0 }
 0x100   :  { %v757_v62 = vadd.f32 %v756_v59, %v755_v56  ;;  %v762_v15 = vsel %vm732_vm2, %v683_v0, 0.0 }
 0x101   :  { %v758_v1 = vsel %vm732_vm2, %v681_v60, 0.0  ;;  %v1200_v2 = vpop.f32.mrb[16].mxu0  ;;  %v1602_v49 = vpop.f32.mrb[16].mxu1 }
 0x102   :  { %v759_v4 = vadd.f32 %v758_v1, %v757_v62  ;;  %v477_v6 = vpop.f32.mrb[17].mxu0  ;;  %v486_v8 = vadd.f32 %v1200_v2, %v1510_v38  ;;  %v1604_v51 = vpop.f32.mrb[17].mxu1 }
 0x103   :  { %v478_v10 = vadd.f32 %v1510_v38, %v477_v6  ;;  %v1201_v12 = vpop.f32.mrb[18].mxu0  ;;  %v1607_v56 = vpop.f32.mrb[18].mxu1 }
 0x104   :  { %v761_v13 = vadd.f32 %v760_v7, %v759_v4  ;;  %v480_v14 = vpop.f32.mrb[19].mxu0  ;;  %v489_v17 = vadd.f32 %v1201_v12, %v1510_v38  ;;  %v686_v22 = vmax.f32 %v486_v8, 0.0  ;;  %v1609_v59 = vpop.f32.mrb[19].mxu1 }
 0x105   :  { %v684_v16 = vmax.f32 %v478_v10, 0.0  ;;  %v481_v18 = vadd.f32 %v1510_v38, %v480_v14 }
 0x106   :  { %v763_v20 = vadd.f32 %v762_v15, %v761_v13  ;;  %v687_v29 = vmax.f32 %v489_v17, 0.0  ;;  %v768_v37 = vsel %vm732_vm2, %v686_v22, 0.0 }
 0x107   :  { %v764_v23 = vsel %vm732_vm2, %v684_v16, 0.0  ;;  %v685_v24 = vmax.f32 %v481_v18, 0.0 }
 0x108   :  { %v765_v26 = vadd.f32 %v764_v23, %v763_v20  ;;  %v770_v45 = vsel %vm732_vm2, %v687_v29, 0.0 }
 0x109   :  { %v766_v31 = vsel %vm732_vm2, %v685_v24, 0.0  ;;  %v1204_v32 = vpop.f32.mrb[20].mxu0  ;;  %v1618_v17 = vpop.f32.mrb[20].mxu1 }
 0x10a   :  { %v767_v33 = vadd.f32 %v766_v31, %v765_v26  ;;  %v493_v34 = vpop.f32.mrb[21].mxu0  ;;  %v502_v40 = vadd.f32 %v1204_v32, %v1510_v38  ;;  %v1620_v20 = vpop.f32.mrb[21].mxu1 }
 0x10b   :  { %v494_v41 = vadd.f32 %v1510_v38, %v493_v34  ;;  %v1205_v42 = vpop.f32.mrb[22].mxu0  ;;  %v1623_v26 = vpop.f32.mrb[22].mxu1 }
 0x10c   :  { %v769_v43 = vadd.f32 %v768_v37, %v767_v33  ;;  %v496_v44 = vpop.f32.mrb[23].mxu0  ;;  %v505_v47 = vadd.f32 %v1205_v42, %v1510_v38  ;;  %v690_v52 = vmax.f32 %v502_v40, 0.0  ;;  %v1625_v31 = vpop.f32.mrb[23].mxu1 }
 0x10d   :  { %v688_v46 = vmax.f32 %v494_v41, 0.0  ;;  %v497_v48 = vadd.f32 %v1510_v38, %v496_v44 }
 0x10e   :  { %v771_v50 = vadd.f32 %v770_v45, %v769_v43  ;;  %v691_v60 = vmax.f32 %v505_v47, 0.0  ;;  %v776_v4 = vsel %vm732_vm2, %v690_v52, 0.0 }
 0x10f   :  { %v772_v53 = vsel %vm732_vm2, %v688_v46, 0.0  ;;  %v689_v54 = vmax.f32 %v497_v48, 0.0 }
 0x110   :  { %v773_v58 = vadd.f32 %v772_v53, %v771_v50  ;;  %v778_v13 = vsel %vm732_vm2, %v691_v60, 0.0 }
 0x111   :  { %v774_v62 = vsel %vm732_vm2, %v689_v54, 0.0  ;;  %v1208_v0 = vpop.f32.mrb[24].mxu0 }
 0x112   :  { %v775_v1 = vadd.f32 %v774_v62, %v773_v58  ;;  %v509_v2 = vpop.f32.mrb[25].mxu0  ;;  %v518_v6 = vadd.f32 %v1208_v0, %v1510_v38 }
 0x113   :  { %v510_v7 = vadd.f32 %v1510_v38, %v509_v2  ;;  %v1209_v8 = vpop.f32.mrb[26].mxu0 }
 0x114   :  { %v777_v10 = vadd.f32 %v776_v4, %v775_v1  ;;  %v512_v12 = vpop.f32.mrb[27].mxu0  ;;  %v521_v15 = vadd.f32 %v1209_v8, %v1510_v38  ;;  %v694_v22 = vmax.f32 %v518_v6, 0.0 }
 0x115   :  { %v692_v14 = vmax.f32 %v510_v7, 0.0  ;;  %v513_v16 = vadd.f32 %v1510_v38, %v512_v12 }
 0x116   :  { %v779_v18 = vadd.f32 %v778_v13, %v777_v10  ;;  %v695_v32 = vmax.f32 %v521_v15, 0.0  ;;  %v784_v41 = vsel %vm732_vm2, %v694_v22, 0.0 }
 0x117   :  { %v780_v23 = vsel %vm732_vm2, %v692_v14, 0.0  ;;  %v693_v24 = vmax.f32 %v513_v16, 0.0 }
 0x118   :  { %v781_v29 = vadd.f32 %v780_v23, %v779_v18  ;;  %v786_v47 = vsel %vm732_vm2, %v695_v32, 0.0 }
 0x119   :  { %v782_v33 = vsel %vm732_vm2, %v693_v24, 0.0  ;;  %v1212_v34 = vpop.f32.mrb[28].mxu0 }
 0x11a   :  { %v783_v37 = vadd.f32 %v782_v33, %v781_v29  ;;  %v525_v40 = vpop.f32.mrb[29].mxu0  ;;  %v534_v42 = vadd.f32 %v1212_v34, %v1510_v38 }
 0x11b   :  { %v526_v43 = vadd.f32 %v1510_v38, %v525_v40  ;;  %v1213_v44 = vpop.f32.mrb[30].mxu0 }
 0x11c   :  { %v785_v45 = vadd.f32 %v784_v41, %v783_v37  ;;  %v528_v46 = vpop.f32.mrb[31].mxu0  ;;  %v537_v50 = vadd.f32 %v1213_v44, %v1510_v38  ;;  %v698_v54 = vmax.f32 %v534_v42, 0.0 }
 0x11d   :  { %v696_v48 = vmax.f32 %v526_v43, 0.0  ;;  %v529_v52 = vadd.f32 %v1510_v38, %v528_v46 }
 0x11e   :  { %v787_v53 = vadd.f32 %v786_v47, %v785_v45  ;;  %v699_v0 = vmax.f32 %v537_v50, 0.0  ;;  %v792_v7 = vsel %vm732_vm2, %v698_v54, 0.0 }
 0x11f   :  { %v788_v58 = vsel %vm732_vm2, %v696_v48, 0.0  ;;  %v697_v60 = vmax.f32 %v529_v52, 0.0  ;;  %v574_v48 = vadd.f32 %v1510_v38, %v1530_v5  ;;  %v577_v5 = vadd.f32 %v1510_v38, %v1535_v11 }
 0x120   :  { %v789_v62 = vadd.f32 %v788_v58, %v787_v53  ;;  %v794_v15 = vsel %vm732_vm2, %v699_v0, 0.0 }
 0x121   :  { %v790_v1 = vsel %vm732_vm2, %v697_v60, 0.0  ;;  %v1216_v2 = vpop.f32.mrb[32].mxu0 }
 0x122   :  { %v791_v4 = vadd.f32 %v790_v1, %v789_v62  ;;  %v541_v6 = vpop.f32.mrb[33].mxu0  ;;  %v550_v8 = vadd.f32 %v1216_v2, %v1510_v38 }
 0x123   :  { %v542_v10 = vadd.f32 %v1510_v38, %v541_v6  ;;  %v1217_v12 = vpop.f32.mrb[34].mxu0  ;;  %v708_v6 = vmax.f32 %v574_v48, 0.0 }
 0x124   :  { %v793_v13 = vadd.f32 %v792_v7, %v791_v4  ;;  %v544_v14 = vpop.f32.mrb[35].mxu0  ;;  %v553_v18 = vadd.f32 %v1217_v12, %v1510_v38  ;;  %v702_v24 = vmax.f32 %v550_v8, 0.0 }
 0x125   :  { %v700_v16 = vmax.f32 %v542_v10, 0.0  ;;  %v545_v22 = vadd.f32 %v1510_v38, %v544_v14  ;;  %v582_v10 = vadd.f32 %v1528_v3, %v1510_v38  ;;  %v593_v3 = vadd.f32 %v1510_v38, %v1558_v39 }
 0x126   :  { %v1642_v23 = vadd.f32 %v794_v15, %v793_v13  ;;  %v703_v33 = vmax.f32 %v553_v18, 0.0  ;;  %v805_v42 = vsel %vm732_vm2, %v702_v24, 0.0  ;;  %v585_v13 = vadd.f32 %v1533_v9, %v1510_v38 }
 0x127   :  { %v701_v29 = vmax.f32 %v545_v22, 0.0  ;;  %v802_v32 = vsel %vm732_vm2, %v700_v16, 0.0  ;;  %v817_v15 = vsel %vm732_vm2, %v708_v6, 0.0  ;;  %v709_v16 = vmax.f32 %v577_v5, 0.0 }
 0x128   :  { %v807_v50 = vsel %vm732_vm2, %v703_v33, 0.0  ;;  %v590_v18 = vadd.f32 %v1510_v38, %v1550_v30  ;;  %v710_v11 = vmax.f32 %v582_v10, 0.0  ;;  %v601_v30 = vadd.f32 %v1556_v35, %v1510_v38 }
 0x129   :  { %v803_v34 = vsel %vm732_vm2, %v701_v29, 0.0  ;;  %v1220_v37 = vpop.f32.mrb[36].mxu0  ;;  %v711_v29 = vmax.f32 %v585_v13, 0.0 }
 0x12a   :  { %v804_v40 = vadd.f32 %v803_v34, %v802_v32  ;;  %v557_v41 = vpop.f32.mrb[37].mxu0  ;;  %v566_v43 = vadd.f32 %v1220_v37, %v1510_v38  ;;  %v819_v32 = vsel %vm732_vm2, %v709_v16, 0.0  ;;  %v712_v33 = vmax.f32 %v590_v18, 0.0 }
 0x12b   :  { %v558_v44 = vadd.f32 %v1510_v38, %v557_v41  ;;  %v1221_v45 = vpop.f32.mrb[38].mxu0  ;;  %v821_v9 = vsel %vm732_vm2, %v710_v11, 0.0  ;;  %v598_v37 = vadd.f32 %v1547_v28, %v1510_v38  ;;  %v823_v41 = vsel %vm732_vm2, %v711_v29, 0.0 }
 0x12c   :  { %v806_v46 = vadd.f32 %v805_v42, %v804_v40  ;;  %v560_v47 = vpop.f32.mrb[39].mxu0  ;;  %v569_v53 = vadd.f32 %v1221_v45, %v1510_v38  ;;  %v706_v60 = vmax.f32 %v566_v43, 0.0  ;;  %v825_v42 = vsel %vm732_vm2, %v712_v33, 0.0 }
 0x12d   :  { %v704_v52 = vmax.f32 %v558_v44, 0.0  ;;  %v561_v54 = vadd.f32 %v1510_v38, %v560_v47  ;;  %v713_v43 = vmax.f32 %v593_v3, 0.0  ;;  %v606_v44 = vadd.f32 %v1510_v38, %v1572_v57 }
 0x12e   :  { %v808_v58 = vadd.f32 %v807_v50, %v806_v46  ;;  %v707_v2 = vmax.f32 %v569_v53, 0.0  ;;  %v813_v8 = vsel %vm732_vm2, %v706_v60, 0.0  ;;  %v714_v39 = vmax.f32 %v598_v37, 0.0 }
 0x12f   :  { %v809_v62 = vsel %vm732_vm2, %v704_v52, 0.0  ;;  %v705_v0 = vmax.f32 %v561_v54, 0.0  ;;  %v715_v47 = vmax.f32 %v601_v30, 0.0  ;;  %v827_v48 = vsel %vm732_vm2, %v713_v43, 0.0 }
 0x130   :  { %v810_v1 = vadd.f32 %v809_v62, %v808_v58  ;;  %v815_v14 = vsel %vm732_vm2, %v707_v2, 0.0  ;;  %v716_v50 = vmax.f32 %v606_v44, 0.0  ;;  %v609_v28 = vadd.f32 %v1510_v38, %v1577_v63 }
 0x131   :  { %v811_v4 = vsel %vm732_vm2, %v705_v0, 0.0  ;;  %v829_v35 = vsel %vm732_vm2, %v714_v39, 0.0  ;;  %v614_v53 = vadd.f32 %v1570_v55, %v1510_v38  ;;  %v831_v54 = vsel %vm732_vm2, %v715_v47, 0.0 }
 0x132   :  { %v812_v7 = vadd.f32 %v811_v4, %v810_v1  ;;  %v833_v57 = vsel %vm732_vm2, %v716_v50, 0.0  ;;  %v617_v60 = vadd.f32 %v1575_v61, %v1510_v38  ;;  %v717_v62 = vmax.f32 %v609_v28, 0.0 }
 0x133   :  { %v622_v0 = vadd.f32 %v1510_v38, %v1588_v21  ;;  %v718_v63 = vmax.f32 %v614_v53, 0.0  ;;  %v625_v55 = vadd.f32 %v1510_v38, %v1593_v27  ;;  %v630_v61 = vadd.f32 %v1586_v19, %v1510_v38 }
 0x134   :  { %v814_v12 = vadd.f32 %v813_v8, %v812_v7  ;;  %v719_v4 = vmax.f32 %v617_v60, 0.0  ;;  %v835_v6 = vsel %vm732_vm2, %v717_v62, 0.0  ;;  %v633_v21 = vadd.f32 %v1591_v25, %v1510_v38 }
 0x135   :  { %v720_v5 = vmax.f32 %v622_v0, 0.0  ;;  %v837_v8 = vsel %vm732_vm2, %v718_v63, 0.0  ;;  %v722_v27 = vmax.f32 %v630_v61, 0.0  ;;  %v641_v19 = vadd.f32 %v1510_v38, %v1609_v59 }
 0x136   :  { %v816_v22 = vadd.f32 %v815_v14, %v814_v12  ;;  %v839_v12 = vsel %vm732_vm2, %v719_v4, 0.0  ;;  %v721_v14 = vmax.f32 %v625_v55, 0.0  ;;  %v654_v37 = vadd.f32 %v1510_v38, %v1620_v20 }
 0x137   :  { %v841_v13 = vsel %vm732_vm2, %v720_v5, 0.0  ;;  %v845_v25 = vsel %vm732_vm2, %v722_v27, 0.0  ;;  %v796_v44 = vrot.slane %v1642_v23, 4 }
 0x138   :  { %v818_v24 = vadd.f32 %v817_v15, %v816_v22  ;;  %v638_v15 = vadd.f32 %v1510_v38, %v1604_v51  ;;  %v723_v22 = vmax.f32 %v633_v21, 0.0  ;;  %v843_v11 = vsel %vm732_vm2, %v721_v14, 0.0  ;;  %v1319_v21 = vld [vmem:[%s1762_s5] sm:$0xff]   ;;  %v1321_v14 = vld [vmem:[%s1762_s5 + $0x10] sm:$0xff]  }
 0x139   :  { %v728_v43 = vmax.f32 %v654_v37, 0.0  ;;  %v797_v28 = vadd.f32 %v796_v44, %v1642_v23 }
 0x13a   :  { %v820_v34 = vadd.f32 %v819_v32, %v818_v24  ;;  %v724_v24 = vmax.f32 %v638_v15, 0.0  ;;  %v646_v32 = vadd.f32 %v1602_v49, %v1510_v38  ;;  %v847_v33 = vsel %vm732_vm2, %v723_v22, 0.0  ;;  %v1322_v15 = vld [vmem:[%s1762_s5 + $0x18] sm:$0xff]  }
 0x13b   :  { %v657_v49 = vadd.f32 %v1510_v38, %v1625_v31  ;;  %v857_v47 = vsel %vm732_vm2, %v728_v43, 0.0 }
 0x13c   :  { %v822_v40 = vadd.f32 %v821_v9, %v820_v34  ;;  %v849_v51 = vsel %vm732_vm2, %v724_v24, 0.0  ;;  %v649_v34 = vadd.f32 %v1607_v56, %v1510_v38  ;;  %v725_v9 = vmax.f32 %v641_v19, 0.0 }
 0x13d   :  { %v726_v59 = vmax.f32 %v646_v32, 0.0  ;;  %v662_v56 = vadd.f32 %v1618_v17, %v1510_v38  ;;  %v729_v50 = vmax.f32 %v657_v49, 0.0 }
 0x13e   :  { %v824_v45 = vadd.f32 %v823_v41, %v822_v40  ;;  %v727_v41 = vmax.f32 %v649_v34, 0.0 }
 0x13f   :  { %v853_v39 = vsel %vm732_vm2, %v726_v59, 0.0 }
 0x140   :  { %v826_v46 = vadd.f32 %v825_v42, %v824_v45  ;;  %v851_v42 = vsel %vm732_vm2, %v725_v9, 0.0  ;;  %v855_v20 = vsel %vm732_vm2, %v727_v41, 0.0 }
 0x142   :  { %v828_v52 = vadd.f32 %v827_v48, %v826_v46  ;;  %v665_v48 = vadd.f32 %v1623_v26, %v1510_v38 }
 0x144   :  { %v830_v58 = vadd.f32 %v829_v35, %v828_v52  ;;  %v730_v52 = vmax.f32 %v662_v56, 0.0  ;;  %v731_v53 = vmax.f32 %v665_v48, 0.0 }
 0x146   :  { %v832_v1 = vadd.f32 %v831_v54, %v830_v58  ;;  %v859_v54 = vsel %vm732_vm2, %v729_v50, 0.0  ;;  %v798_v58 = vrot.slane %v797_v28, 2  ;;  %v861_v17 = vsel %vm732_vm2, %v730_v52, 0.0 }
 0x147   :  { %v863_v62 = vsel %vm732_vm2, %v731_v53, 0.0 }
 0x148   :  { %v834_v2 = vadd.f32 %v833_v57, %v832_v1  ;;  %v799_v0 = vadd.f32 %v798_v58, %v797_v28 }
 0x14a   :  { %v836_v7 = vadd.f32 %v835_v6, %v834_v2  ;;  %v800_v38 = vrot.slane %v799_v0, 1 }
 0x14c   :  { %v838_v10 = vadd.f32 %v837_v8, %v836_v7  ;;  %v801_v23 = vadd.f32 %v800_v38, %v799_v0 }
 0x14e   :  { %v840_v16 = vadd.f32 %v839_v12, %v838_v10  ;;  %v871_v5 = vpack.c.bf16 %v801_v23, %v801_v23 }
 0x150   :  { %v842_v18 = vadd.f32 %v841_v13, %v840_v16  ;;  %v890_v8 = vunpack.c.l.b16 %v871_v5  ;;  %v1320_v13 = vld [vmem:[%s1762_s5 + $0x8] sm:$0xff]   ;;  %v1119_v16 = vld [vmem:[%s1763_s4] ss:$0 sm:$0xff] }
 0x152   :  { %v844_v29 = vadd.f32 %v843_v11, %v842_v18 }
 0x154   :  { %v846_v3 = vadd.f32 %v845_v25, %v844_v29 }
 0x156   :  { %v848_v40 = vadd.f32 %v847_v33, %v846_v3 }
 0x158   :  { %v850_v30 = vadd.f32 %v849_v51, %v848_v40 }
 0x15a   :  { %v852_v45 = vadd.f32 %v851_v42, %v850_v30 }
 0x15c   :  { %v854_v46 = vadd.f32 %v853_v39, %v852_v45 }
 0x15e   :  { %v856_v31 = vadd.f32 %v855_v20, %v854_v46 }
 0x160   :  { %v858_v35 = vadd.f32 %v857_v47, %v856_v31 }
 0x162   :  { %v860_v57 = vadd.f32 %v859_v54, %v858_v35 }
 0x164   :  { %v862_v60 = vadd.f32 %v861_v17, %v860_v57 }
 0x166   :  { %v864_v1 = vadd.f32 %v863_v62, %v862_v60 }
 0x168   :  { %v865_v63 = vrot.slane %v864_v1, 4 }
 0x16a   :  { %v866_v26 = vadd.f32 %v865_v63, %v864_v1 }
 0x16c   :  { %v867_v2 = vrot.slane %v866_v26, 2 }
 0x16e   :  { %v868_v4 = vadd.f32 %v867_v2, %v866_v26 }
 0x170   :  { %v869_v6 = vrot.slane %v868_v4, 1 }
 0x172   :  { %v870_v55 = vadd.f32 %v869_v6, %v868_v4 }
 0x174   :  { %v872_v7 = vpack.c.bf16 %v870_v55, %v870_v55 }
 0x176   :  { %v891_v61 = vunpack.c.l.b16 %v872_v7 }
 0x178   :  { %v893_v10 = vsel %vm892_vm4, %v891_v61, %v890_v8 }
 0x179   :  { %v894_v12 = vpack.c.b16 %v893_v10, %v893_v10 }
 0x17b   :  { %1255 = vmatmul.mubr.msk.bf16.vlgmr.msra.gmra.mrb[24].mxu1 %vm732_vm2, %v894_v12 }
 0x17c   :  { %1259 = vmatpush3.bf16.msra.mxu1 %v1319_v21  ;;  %1266 = vmatprep.mubr.msk.bf16.mxu1 %vm1324_vm3, %v1323_v36 }
 0x17d   :  { %1260 = vmatprep.subr.bf16.mxu1 %v1323_v36 }
 0x180   :  { %1261 = vmatpush3.bf16.msra.mxu1 %v1320_v13 }
 0x181   :  { %1262 = vmatprep.subr.bf16.mxu1 %v1323_v36 }
 0x184   :  { %1263 = vmatpush3.bf16.msra.mxu1 %v1321_v14 }
 0x185   :  { %1264 = vmatprep.subr.bf16.mxu1 %v1323_v36  ;;  %v1125_v36 = vld [vmem:[%s1764_s6] ss:$0 sm:$0xff] }
 0x188   :  { %1265 = vmatpush3.bf16.msra.mxu1 %v1322_v15 }
 0x24e   :  { %v956_v27 = vpop.f32.mrb[24].mxu1 }
 0x24f   :  { %v957_v18 = vadd.f32 %v1119_v16, %v956_v27  ;;  %v1256_v22 = vpop.f32.mrb[25].mxu1 }
 0x250   :  { %v959_v11 = vpop.f32.mrb[26].mxu1 }
 0x251   :  { %v962_v24 = vmax.f32 %v957_v18, 0.0  ;;  %v1257_v19 = vpop.f32.mrb[27].mxu1 }
 0x253   :  { %v963_v29 = vpack.c.bf16 %v962_v24, %v962_v24 }
 0x255   :  { %1267 = vmatmul.mubr.msk.bf16.vlgmr.msra.gmra.mrb[28].mxu1 %vm732_vm2, %v963_v29 }
 0x328   :  { %v1040_v25 = vpop.f32.mrb[28].mxu1 }
 0x329   :  { %v1041_v32 = vadd.f32 %v1125_v36, %v1040_v25  ;;  %v1268_v33 = vpop.f32.mrb[29].mxu1 }
 0x32a   :  { %v1043_v3 = vpop.f32.mrb[30].mxu1 }
 0x32b   :  { %1046 = vst [vmem:[%s1765_s7] sm:$0x3] %v1041_v32  ;;  %v1269_v51 = vpop.f32.mrb[31].mxu1 }

</bundles_post_ra>
